<compile_context>
chip_gen: v7x
topology: tpu7x:2x2x1
jax: 0.10.0
libtpu: 0.0.40
codegen_flags: <defaults>
</compile_context>

<pallas_src>
import jax
import jax.numpy as jnp
from jax.experimental import pallas as pl
from jax.experimental.pallas import tpu as pltpu

EPS = 1e-6

# Per-streamed-buffer VMEM budget (bytes). With 2-3 streamed arrays double
# buffered this stays well under the smallest default scoped VMEM (16 MiB, v5e).
_TILE_BYTES = 2 << 20


def _round_up(v, m):
    return ((v + m - 1) // m) * m


def _pick_tile(extent, unit, max_tile):
    """Largest tile (multiple of `unit`, <= max_tile) not larger than the
    unit-rounded extent."""
    max_tile = max(unit, (max_tile // unit) * unit)
    return min(_round_up(extent, unit), max_tile)


# ---------------------------------------------------------------------------
# LayerNorm kernels
# ---------------------------------------------------------------------------

def _ln_rows_kernel(x_ref, alpha_ref, bias_ref, o_ref):
    # x_ref: (tile_r, F) with F % 128 == 0 (features on lanes -> lane dense).
    x = x_ref[...].astype(jnp.float32)
    f = x.shape[-1]
    denom = float(max(f - 1, 1))            # unbiased (torch.std default)
    mean = jnp.mean(x, axis=-1, keepdims=True)
    d = x - mean
    var = jnp.sum(d * d, axis=-1, keepdims=True) * (1.0 / denom)
    inv = pl.reciprocal(jnp.sqrt(var) + jnp.float32(EPS), approx=False)
    y = d * inv * alpha_ref[...].astype(jnp.float32) + bias_ref[...].astype(jnp.float32)
    o_ref[...] = y.astype(o_ref.dtype)


def _ln_cols_kernel(x_ref, alpha_ref, bias_ref, o_ref):
    # x_ref: (F, tile_c) -- features on sublanes, rows on the (>=128) lane axis.
    x = x_ref[...].astype(jnp.float32)
    f = x.shape[0]
    denom = float(max(f - 1, 1))            # unbiased (torch.std default)
    mean = jnp.mean(x, axis=0, keepdims=True)          # (1, tile_c)
    d = x - mean
    var = jnp.sum(d * d, axis=0, keepdims=True) * (1.0 / denom)
    inv = pl.reciprocal(jnp.sqrt(var) + jnp.float32(EPS), approx=False)
    y = d * inv * alpha_ref[...].astype(jnp.float32) + bias_ref[...].astype(jnp.float32)
    o_ref[...] = y.astype(o_ref.dtype)


def layernorm_pallas(x, alpha, bias):
    """LayerNormalization over the last axis of x (any leading shape)."""
    orig_shape = x.shape
    F = orig_shape[-1]
    R = x.size // F
    x2d = x.reshape(R, F)
    dtype = x.dtype

    if F % 128 == 0:
        # Features already lane-dense: tile over rows.
        budget_rows = max(8, ((_TILE_BYTES // (4 * F)) // 8) * 8)
        tile_r = _pick_tile(R, 8, min(1024, budget_rows))
        R_pad = _round_up(R, tile_r)
        xin = jnp.pad(x2d, ((0, R_pad - R), (0, 0))) if R_pad != R else x2d
        out = pl.pallas_call(
            _ln_rows_kernel,
            out_shape=jax.ShapeDtypeStruct((R_pad, F), dtype),
            grid_spec=pltpu.PrefetchScalarGridSpec(
                num_scalar_prefetch=0,
                grid=(R_pad // tile_r,),
                in_specs=[
                    pl.BlockSpec((tile_r, F), lambda i: (i, 0)),
                    pl.BlockSpec((1, F), lambda i: (0, 0)),
                    pl.BlockSpec((1, F), lambda i: (0, 0)),
                ],
                out_specs=pl.BlockSpec((tile_r, F), lambda i: (i, 0)),
            ),
            compiler_params=pltpu.CompilerParams(
                dimension_semantics=("parallel",)),
        )(xin, alpha.reshape(1, F), bias.reshape(1, F))
        return out[:R].reshape(orig_shape)

    # Small / non-128-multiple F: put rows on the lane axis (lane-dense output),
    # reduce over the sublane (feature) axis. Layout plumbing done in the wrapper.
    xt = x2d.T  # (F, R)
    budget_cols = max(128, ((_TILE_BYTES // (4 * F)) // 128) * 128)
    tile_c = _pick_tile(R, 128, min(2048, budget_cols))
    R_pad = _round_up(R, tile_c)
    xin = jnp.pad(xt, ((0, 0), (0, R_pad - R))) if R_pad != R else xt
    out = pl.pallas_call(
        _ln_cols_kernel,
        out_shape=jax.ShapeDtypeStruct((F, R_pad), dtype),
        grid_spec=pltpu.PrefetchScalarGridSpec(
            num_scalar_prefetch=0,
            grid=(R_pad // tile_c,),
            in_specs=[
                pl.BlockSpec((F, tile_c), lambda j: (0, j)),
                pl.BlockSpec((F, 1), lambda j: (0, 0)),
                pl.BlockSpec((F, 1), lambda j: (0, 0)),
            ],
            out_specs=pl.BlockSpec((F, tile_c), lambda j: (0, j)),
        ),
        compiler_params=pltpu.CompilerParams(
            dimension_semantics=("parallel",)),
    )(xin, alpha.reshape(F, 1), bias.reshape(F, 1))
    return out[:, :R].T.reshape(orig_shape)


# ---------------------------------------------------------------------------
# Residual add (eval-mode dropout == identity)
# ---------------------------------------------------------------------------

def _add_kernel(x_ref, s_ref, o_ref):
    o_ref[...] = x_ref[...] + s_ref[...]


def residual_add_pallas(x, s):
    """x + s, elementwise, via a lane-dense tiled kernel.

    Lane width C is chosen adaptively (widest of 4096..128 that divides the
    element count) so the common case needs no padding pass and stores are
    wide, unmasked vst.
    """
    assert x.shape == s.shape
    orig_shape = x.shape
    dtype = x.dtype
    n = x.size

    C = 128
    for c in (4096, 2048, 1024, 512, 256, 128):
        if n % c == 0:
            C = c
            break

    rows = max(1, _round_up(n, C) // C)
    budget_rows = max(8, ((_TILE_BYTES // (4 * C)) // 8) * 8)
    tile_r = _pick_tile(rows, 8, min(512, budget_rows))
    rows_pad = _round_up(rows, tile_r)
    n_pad = rows_pad * C

    xf = x.reshape(-1)
    sf = s.astype(dtype).reshape(-1)
    if n_pad != n:
        xf = jnp.pad(xf, (0, n_pad - n))
        sf = jnp.pad(sf, (0, n_pad - n))
    xf = xf.reshape(rows_pad, C)
    sf = sf.reshape(rows_pad, C)

    out = pl.pallas_call(
        _add_kernel,
        out_shape=jax.ShapeDtypeStruct((rows_pad, C), dtype),
        grid_spec=pltpu.PrefetchScalarGridSpec(
            num_scalar_prefetch=0,
            grid=(rows_pad // tile_r,),
            in_specs=[
                pl.BlockSpec((tile_r, C), lambda i: (i, 0)),
                pl.BlockSpec((tile_r, C), lambda i: (i, 0)),
            ],
            out_specs=pl.BlockSpec((tile_r, C), lambda i: (i, 0)),
        ),
        compiler_params=pltpu.CompilerParams(
            dimension_semantics=("parallel",)),
    )(xf, sf)
    if n_pad != n:
        return out.reshape(-1)[:n].reshape(orig_shape)
    return out.reshape(orig_shape)


# ---------------------------------------------------------------------------
# Module wrapper
# ---------------------------------------------------------------------------

class ResidualConnectionPallas:
    """JAX/Pallas equivalent of ResidualConnection(features, dropout)."""

    def __init__(self, features: int, dropout: float = 0.0):
        self.features = features
        self.dropout_p = float(dropout)
        # LayerNormalization parameters (ones / zeros, as in the PyTorch module).
        self.alpha = jnp.ones((features,), jnp.float32)
        self.bias = jnp.zeros((features,), jnp.float32)

    def __call__(self, x, sublayer):
        normed = layernorm_pallas(x, self.alpha, self.bias)
        s = sublayer(normed)
        # Eval-mode dropout == identity.
        # TODO(synk): training-mode dropout (stochastic; would use pltpu.prng_* in the add kernel).
        return residual_add_pallas(x, s)


# ---------------------------------------------------------------------------
# Reference + self-test
# ---------------------------------------------------------------------------

def _reference_forward(x, alpha, bias, sublayer, eps=EPS):
    f = x.shape[-1]
    mean = jnp.mean(x, axis=-1, keepdims=True)
    d = x - mean
    var = jnp.sum(d * d, axis=-1, keepdims=True) / max(f - 1, 1)
    normed = alpha * d / (jnp.sqrt(var) + eps) + bias
    return x + sublayer(normed)        # eval-mode dropout == identity


if __name__ == "__main__":
    key = jax.random.PRNGKey(0)
    kx, kx2, kx3 = jax.random.split(key, 3)

    # Case 1: small feature dim (F=32) -> lane-dense transposed LayerNorm path.
    B, S, F = 2, 8, 32
    x = jax.random.normal(kx, (B, S, F), dtype=jnp.float32)
    sublayer = lambda y: 0.5 * jnp.tanh(y)          # deterministic stand-in sublayer

    block = ResidualConnectionPallas(F, dropout=0.1)
    out = jax.block_until_ready(block(x, sublayer))
    ref = _reference_forward(x, block.alpha, block.bias, sublayer)
    assert out.shape == (B, S, F)
    assert jnp.allclose(out, ref, atol=1e-5, rtol=1e-5), "mismatch (F=32 path)"

    # Case 2: F % 128 == 0 -> direct row-tiled LayerNorm path.
    F2 = 128
    x2 = jax.random.normal(kx2, (B, S, F2), dtype=jnp.float32)
    block2 = ResidualConnectionPallas(F2, dropout=0.0)
    identity = lambda y: y
    out2 = jax.block_until_ready(block2(x2, identity))
    ref2 = _reference_forward(x2, block2.alpha, block2.bias, identity)
    assert jnp.allclose(out2, ref2, atol=1e-5, rtol=1e-5), "mismatch (F=128 path)"

    # Case 3: non-divisible row count (exercises row padding + adaptive add width).
    B3, S3, F3 = 3, 5, 256
    x3 = jax.random.normal(kx3, (B3, S3, F3), dtype=jnp.float32)
    block3 = ResidualConnectionPallas(F3, dropout=0.0)
    out3 = jax.block_until_ready(block3(x3, sublayer))
    ref3 = _reference_forward(x3, block3.alpha, block3.bias, sublayer)
    assert jnp.allclose(out3, ref3, atol=1e-5, rtol=1e-5), "mismatch (padded path)"

    print("KERNEL_OK")
</pallas_src>

<mosaic_0001>
module attributes {stable_mosaic.version = 11 : i64} {
  func.func @_ln_cols_kernel(%arg0: i32, %arg1: memref<32x128xf32, #tpu.memory_space<vmem>>, %arg2: memref<32x1xf32, #tpu.memory_space<vmem>>, %arg3: memref<32x1xf32, #tpu.memory_space<vmem>>, %arg4: memref<32x128xf32, #tpu.memory_space<vmem>>) attributes {dimension_semantics = [#tpu.dimension_semantics<parallel>], iteration_bounds = array<i64: 1>, scalar_prefetch = 0 : i64, scratch_operands = 0 : i64, tpu.core_type = #tpu.core_type<tc>, window_params = [{transform_indices = @transform_0, window_bounds = array<i64: 32, 128>}, {pipeline_mode = #tpu.pipeline_mode<synchronous>, transform_indices = @transform_1, window_bounds = array<i64: 32, 1>}, {pipeline_mode = #tpu.pipeline_mode<synchronous>, transform_indices = @transform_2, window_bounds = array<i64: 32, 1>}, {transform_indices = @transform_3, window_bounds = array<i64: 32, 128>}]} {
    %c0 = arith.constant 0 : index
    %c0_0 = arith.constant 0 : index
    %0 = vector.load %arg1[%c0, %c0_0] : memref<32x128xf32, #tpu.memory_space<vmem>>, vector<32x128xf32>
    %cst = arith.constant dense<0.000000e+00> : vector<128xf32>
    %1 = vector.multi_reduction <add>, %0, %cst [0] : vector<32x128xf32> to vector<128xf32>
    %2 = vector.shape_cast %1 : vector<128xf32> to vector<1x128xf32>
    %cst_1 = arith.constant 3.200000e+01 : f32
    %3 = vector.broadcast %cst_1 : f32 to vector<1x128xf32>
    %4 = arith.divf %2, %3 : vector<1x128xf32>
    %5 = vector.broadcast %4 : vector<1x128xf32> to vector<32x128xf32>
    %6 = arith.subf %0, %5 : vector<32x128xf32>
    %7 = arith.mulf %6, %6 : vector<32x128xf32>
    %cst_2 = arith.constant dense<0.000000e+00> : vector<128xf32>
    %8 = vector.multi_reduction <add>, %7, %cst_2 [0] : vector<32x128xf32> to vector<128xf32>
    %9 = vector.shape_cast %8 : vector<128xf32> to vector<1x128xf32>
    %cst_3 = arith.constant 0.0322580636 : f32
    %10 = vector.broadcast %cst_3 : f32 to vector<1x128xf32>
    %11 = arith.mulf %9, %10 : vector<1x128xf32>
    %12 = math.sqrt %11 : vector<1x128xf32>
    %cst_4 = arith.constant 9.99999997E-7 : f32
    %13 = vector.broadcast %cst_4 : f32 to vector<1x128xf32>
    %14 = arith.addf %12, %13 : vector<1x128xf32>
    %15 = tpu.reciprocal %14 : vector<1x128xf32> -> vector<1x128xf32>
    %16 = vector.broadcast %15 : vector<1x128xf32> to vector<32x128xf32>
    %17 = arith.mulf %6, %16 : vector<32x128xf32>
    %c0_5 = arith.constant 0 : index
    %c0_6 = arith.constant 0 : index
    %18 = vector.load %arg2[%c0_5, %c0_6] : memref<32x1xf32, #tpu.memory_space<vmem>>, vector<32x1xf32>
    %19 = vector.broadcast %18 : vector<32x1xf32> to vector<32x128xf32>
    %20 = arith.mulf %17, %19 : vector<32x128xf32>
    %c0_7 = arith.constant 0 : index
    %c0_8 = arith.constant 0 : index
    %21 = vector.load %arg3[%c0_7, %c0_8] : memref<32x1xf32, #tpu.memory_space<vmem>>, vector<32x1xf32>
    %22 = vector.broadcast %21 : vector<32x1xf32> to vector<32x128xf32>
    %23 = arith.addf %20, %22 : vector<32x128xf32>
    %c0_9 = arith.constant 0 : index
    %c0_10 = arith.constant 0 : index
    %24 = vector.load %arg4[%c0_9, %c0_10] : memref<32x128xf32, #tpu.memory_space<vmem>>, vector<32x128xf32>
    tpu.vector_store %arg4[%c0_9, %c0_10], %23 {strides = array<i32>} : memref<32x128xf32, #tpu.memory_space<vmem>>, vector<32x128xf32>,
    return
  }
  func.func @transform_0(%arg0: i32) -> (i32, i32) {
    %c0_i32 = arith.constant 0 : i32
    %c0_i32_0 = arith.constant 0 : i32
    return %c0_i32, %arg0 : i32, i32
  }
  func.func @transform_1(%arg0: i32) -> (i32, i32) {
    %c0_i32 = arith.constant 0 : i32
    %c0_i32_0 = arith.constant 0 : i32
    %c0_i32_1 = arith.constant 0 : i32
    return %c0_i32, %c0_i32_0 : i32, i32
  }
  func.func @transform_2(%arg0: i32) -> (i32, i32) {
    %c0_i32 = arith.constant 0 : i32
    %c0_i32_0 = arith.constant 0 : i32
    %c0_i32_1 = arith.constant 0 : i32
    return %c0_i32, %c0_i32_0 : i32, i32
  }
  func.func @transform_3(%arg0: i32) -> (i32, i32) {
    %c0_i32 = arith.constant 0 : i32
    %c0_i32_0 = arith.constant 0 : i32
    return %c0_i32, %arg0 : i32, i32
  }
}

</mosaic_0001>

<bundles_post_ra>
// kernel: tpu_custom_call.1
= control target key start
LH: loop header
LB: loop body
LE: loop exit
PB: predicated region body
PF: predicated region fallthrough
CT: control target
= control target key end

     0   :  { %v171_v2 = vmov 0   ;;  %s243_s0 = inlined_call_operand.vmem [shape: f32[32,128], index: 0, kind: input, shape index: {}]   ;;  %s244_s1 = inlined_call_operand.vmem [shape: f32[32,1], index: 1, kind: input, shape index: {}]   ;;  %s245_s2 = inlined_call_operand.vmem [shape: f32[32,1], index: 2, kind: input, shape index: {}]   ;;  %s246_s3 = inlined_call_operand.hbm [shape: f32[32,128], index: 3, kind: output, shape index: {}]  }
   0x1   :  { %v63_v0 = vld [vmem:[%s244_s1 + $0x10] sm:$0xff]  ;;  %v61_v1 = vld [vmem:[%s244_s1] sm:$0xff]  ;;  %142 = vset.pattern.permute.xlu1 %v171_v2  ;;  %141 = vset.pattern.permute.xlu0 %v171_v2  ;;  %v64_v4 = vld [vmem:[%s244_s1 + $0x18] sm:$0xff] }
   0x2   :  { %77 = vperm.xlu1 %142, %v63_v0   ;;  %67 = vperm.xlu0 %141, %v61_v1   ;;  %v15_v3 = vld [vmem:[%s243_s0] sm:$0xff]  ;;  %v62_v5 = vld [vmem:[%s244_s1 + $0x8] sm:$0xff] }
   0x3   :  { %v16_v6 = vld [vmem:[%s243_s0 + $0x8] sm:$0xff] }
   0x4   :  { %v19_v7 = vadd.f32 %v16_v6, %v15_v3 }
   0x5   :  { %8 = vsyncpa [#allocation3], 0  ;;  %v17_v8 = vld [vmem:[%s243_s0 + $0x10] sm:$0xff]  ;;  %v90_v9 = vld [vmem:[%s245_s2 + $0x8] sm:$0xff] }
   0x6   :  { %82 = vperm.xlu1 %142, %v64_v4   ;;  %72 = vperm.xlu0 %141, %v62_v5   ;;  %v89_v10 = vld [vmem:[%s245_s2] sm:$0xff]  ;;  %v20_v11 = vadd.f32 %v19_v7, %v17_v8  ;;  %v18_v12 = vld [vmem:[%s243_s0 + $0x18] sm:$0xff]  ;;  %v91_v14 = vld [vmem:[%s245_s2 + $0x10] sm:$0xff]  ;;  %s172_s0 = smov [#allocation2]  }
   0x7   :  { %v92_v13 = vld [vmem:[%s245_s2 + $0x18] sm:$0xff]  ;;  %s126_s2 = sshll.u32 %s172_s0, 4  ;;  %s127_s2 = int_to_ptr.vmem [resolvable:$true] %s126_s2 }
   0x8   :  { %v21_v15 = vadd.f32 %v20_v11, %v18_v12  ;;  %s147_s8 = scalar_lea.vmem %s127_s2, 512  ;;  %p152_p1 = scmp.lt.s32.totalorder %s127_s2, %s127_s2 }
   0x9   :  { %p148_p0 = scmp.ne.s32.totalorder %s127_s2, %s147_s8  ;;  %p153_p2 = scmp.lt.s32.totalorder %s147_s8, %s147_s8 }
   0xa   :  { %100 = vperm.xlu1 %142, %v90_v9   ;;  %95 = vperm.xlu0 %141, %v89_v10   ;;  %v22_v16 = vrot.slane %v21_v15, 4 }
   0xb   :  { %p154_p3 = por %p153_p2, %p152_p1 }
   0xc   :  { %v23_v17 = vadd.f32 %v22_v16, %v21_v15 }
   0xd   :  { %p155_p4 = pnand %p154_p3, %p148_p0 }
   0xe   :  { %110 = vperm.xlu1 %142, %v92_v13   ;;  %105 = vperm.xlu0 %141, %v91_v14   ;;  %v24_v18 = vrot.slane %v23_v17, 2 }
  0x10   :  { %v25_v19 = vadd.f32 %v24_v18, %v23_v17 }
  0x12   :  { %v26_v20 = vrot.slane %v25_v19, 1 }
  0x14   :  { %v27_v21 = vadd.f32 %v26_v20, %v25_v19 }
  0x16   :  { %v29_v22 = vmul.f32 0.03125, %v27_v21 }
  0x18   :  { %v30_v23 = vsub.f32 %v15_v3, %v29_v22  ;;  %v31_v24 = vsub.f32 %v16_v6, %v29_v22  ;;  %v32_v25 = vsub.f32 %v17_v8, %v29_v22  ;;  %v33_v28 = vsub.f32 %v18_v12, %v29_v22 }
  0x1a   :  { %v34_v26 = vmul.f32 %v30_v23, %v30_v23  ;;  %v35_v27 = vmul.f32 %v31_v24, %v31_v24  ;;  %v36_v29 = vmul.f32 %v32_v25, %v32_v25  ;;  %v37_v31 = vmul.f32 %v33_v28, %v33_v28 }
  0x1c   :  { %v38_v30 = vadd.f32 %v35_v27, %v34_v26 }
  0x1e   :  { %v39_v32 = vadd.f32 %v38_v30, %v36_v29 }
  0x20   :  { %v40_v33 = vadd.f32 %v39_v32, %v37_v31 }
  0x22   :  { %v41_v34 = vrot.slane %v40_v33, 4 }
  0x24   :  { %v42_v35 = vadd.f32 %v41_v34, %v40_v33 }
  0x26   :  { %v43_v36 = vrot.slane %v42_v35, 2 }
  0x28   :  { %v44_v37 = vadd.f32 %v43_v36, %v42_v35 }
  0x2a   :  { %v45_v38 = vrot.slane %v44_v37, 1 }
  0x2c   :  { %v46_v39 = vadd.f32 %v45_v38, %v44_v37 }
  0x2e   :  { %v47_v40 = vmul.f32 0.032258064, %v46_v39 }
  0x30   :  { %143 = vrsqrt.f32 %v47_v40  ;;  %vm50_vm0 = vcmp.eq.f32.partialorder %v47_v40, inf  ;;  %v53_v43 = vand.u32 2147483648, %v47_v40  ;;  %vm52_vm1 = vcmp.eq.f32.partialorder %v47_v40, 0.0 }
  0x3a   :  { %v144_v41 = vpop.eup %143 }
  0x3b   :  { %v49_v42 = vmul.f32 %v144_v41, %v47_v40 }
  0x3d   :  { %v51_v44 = vsel %vm50_vm0, %v47_v40, %v49_v42 }
  0x3e   :  { %v54_v45 = vsel %vm52_vm1, %v53_v43, %v51_v44 }
  0x3f   :  { %v55_v46 = vadd.f32 1e-06, %v54_v45 }
  0x41   :  { %145 = vrcp.f32 %v55_v46 }
  0x4b   :  { %v146_v47 = vpop.eup %145 }
  0x4c   :  { %v57_v50 = vmul.f32 %v146_v47, %v30_v23  ;;  %v58_v51 = vmul.f32 %v146_v47, %v31_v24  ;;  %v59_v54 = vmul.f32 %v146_v47, %v32_v25  ;;  %v60_v56 = vmul.f32 %v146_v47, %v33_v28 }
  0x81   :  { %v78_v48 = vpop.permute.xlu1 %77  ;;  %v68_v49 = vpop.permute.xlu0 %67 }
  0x82   :  { %v85_v55 = vmul.f32 %v68_v49, %v57_v50  ;;  %v87_v62 = vmul.f32 %v78_v48, %v59_v54 }
  0x85   :  { %v83_v52 = vpop.permute.xlu1 %82  ;;  %v73_v53 = vpop.permute.xlu0 %72 }
  0x86   :  { %v86_v57 = vmul.f32 %v73_v53, %v58_v51  ;;  %v88_v63 = vmul.f32 %v83_v52, %v60_v56 }
  0x89   :  { %v101_v58 = vpop.permute.xlu1 %100  ;;  %v96_v59 = vpop.permute.xlu0 %95 }
  0x8a   :  { %v114_v60 = vadd.f32 %v101_v58, %v86_v57  ;;  %v113_v61 = vadd.f32 %v96_v59, %v85_v55 }
  0x8c   :  { %118 = vst [vmem:[#allocation2 + $0x8] sm:$0xff] %v114_v60  ;;  %117 = vst [vmem:[#allocation2] sm:$0xff] %v113_v61 }
  0x8d   :  { %v111_v0 = vpop.permute.xlu1 %110  ;;  %v106_v1 = vpop.permute.xlu0 %105 }
  0x8e   :  { %v116_v2 = vadd.f32 %v111_v0, %v88_v63  ;;  %v115_v3 = vadd.f32 %v106_v1, %v87_v62 }
  0x90   :  { %120 = vst [vmem:[#allocation2 + $0x18] sm:$0xff] %v116_v2  ;;  %119 = vst [vmem:[#allocation2 + $0x10] sm:$0xff] %v115_v3 }
  0x91   :  { %158 = shalt.err (!%p155_p4)
}
  0x92   :  { %s159_s11 = scalar_lea.hbm %s246_s3, 512 }
  0x93   :  { %p160_p5 = scmp.ne.s32.totalorder %s246_s3, %s159_s11  ;;  %p163_p6 = scmp.lt.u32.totalorder %s159_s11, %s246_s3 }
  0x95   :  { %p165_p7 = pnand %p163_p6, %p160_p5 }
  0x97   :  { %168 = shalt.err (!%p165_p7)
}
  0x98   :  { %s173_s16 = smov 128   ;;  %s174_s17 = smov 8  }
  0x99   :  { %132 = dma.vmem_to_hbm [thread:$0]  %s127_s2, 512, %s246_s3, [#allocation3], %s173_s16, %s173_s16, %s174_s17  }
  0x9a   :  { %169 = dma.done.wait [#allocation3], 512  }
  0x9b   :  { %170 = vsyncadd [#allocation3], 4294966784 }
  0x9c   :  { %136 = vsyncpa [#allocation3], 1 }

</bundles_post_ra>
